<compile_context>
chip_gen: v7x
topology: tpu7x:2x2x1
jax: 0.10.0
libtpu: 0.0.40
codegen_flags: <defaults>
</compile_context>

<pallas_src>
import jax
import jax.numpy as jnp
from jax.experimental import pallas as pl
from jax.experimental.pallas import tpu as pltpu

_LANES = 128
_STAGE_SLOTS = 8          # accumulator rows (sublane axis) -> supports <= 8 stages
_NUM_CORE_SPLITS = 2      # outer "parallel" grid axis (both TCs on v7x)
_MAX_TILE_ROWS = 2048     # 2048*128*4B = 1 MiB per f32 stream per buffer


def _round_up(x, m):
    return ((x + m - 1) // m) * m


def _make_kernel(stage_tile_bounds, tiles_per_core):
    """stage_tile_bounds: cumulative (python int) tile counts, one per stage."""
    bounds = tuple(stage_tile_bounds)

    def kernel(d_ref, g_ref, m_ref, sum_ref, cnt_ref):
        c = pl.program_id(0)          # core split (parallel)
        i = pl.program_id(1)          # row tile   (arbitrary / reduction)

        # Zero the per-core resident accumulators at the start of each sweep.
        @pl.when(i == 0)
        def _init():
            sum_ref[...] = jnp.zeros_like(sum_ref)
            cnt_ref[...] = jnp.zeros_like(cnt_ref)

        # Which stage does this tile belong to (static boundaries -> a couple
        # of scalar compares; dummy padding tiles fall into the last slot but
        # carry an all-zero mask, so they contribute nothing).
        t = c * tiles_per_core + i
        s_idx = jnp.int32(0)
        for b in bounds[:-1]:
            s_idx = s_idx + (t >= b).astype(jnp.int32)

        # Masked smooth-L1 (PyTorch default beta = 1.0), pure vector ops.
        d = d_ref[...] - g_ref[...]
        ad = jnp.abs(d)
        sl1 = jnp.where(ad < 1.0, 0.5 * d * d, ad - 0.5)
        mf = (m_ref[...] != 0).astype(jnp.float32)

        lane_sum = jnp.sum(sl1 * mf, axis=0, keepdims=True)   # (1, 128)
        lane_cnt = jnp.sum(mf, axis=0, keepdims=True)         # (1, 128)

        # Route this tile's partials to its stage's sublane row.
        onehot = (jax.lax.broadcasted_iota(jnp.int32, (_STAGE_SLOTS, _LANES), 0)
                  == s_idx).astype(jnp.float32)                # (8, 128)
        sum_ref[...] = sum_ref[...] + onehot * lane_sum
        cnt_ref[...] = cnt_ref[...] + onehot * lane_cnt

    return kernel


def _fused_masked_smooth_l1(depth_list, gt_list, mask_list):
    """Per-stage mean(smooth_l1(depth[mask], gt[mask])) for every stage in one
    fused, tiled, megacore-parallel Pallas call.  Returns (num_stages,) f32."""
    num_stages = len(depth_list)
    assert 1 <= num_stages <= _STAGE_SLOTS, "at most 8 stages supported"
    # TODO(synk): for >8 stages the sublane one-hot routing needs a second tile.

    elems = [int(d.size) for d in depth_list]
    # rows multiple of 32 so the int8 mask stream hits its native (32,128) tile
    rows_needed = _round_up(max(pl.cdiv(e, _LANES) for e in elems), 32)
    tile_rows = min(_MAX_TILE_ROWS, rows_needed)
    tile_elems = tile_rows * _LANES

    d_pieces, g_pieces, m_pieces, stage_tiles = [], [], [], []
    for d, g, m in zip(depth_list, gt_list, mask_list):
        n = int(d.size)
        nt = pl.cdiv(n, tile_elems)
        pad = nt * tile_elems - n
        stage_tiles.append(nt)
        d_pieces.append(d.reshape(-1).astype(jnp.float32))
        g_pieces.append(g.reshape(-1).astype(jnp.float32))
        m_pieces.append(m.reshape(-1).astype(jnp.int8))
        if pad:
            d_pieces.append(jnp.zeros((pad,), jnp.float32))
            g_pieces.append(jnp.zeros((pad,), jnp.float32))
            m_pieces.append(jnp.zeros((pad,), jnp.int8))

    total_tiles = sum(stage_tiles)
    dummy_tiles = (-total_tiles) % _NUM_CORE_SPLITS
    if dummy_tiles:
        pad = dummy_tiles * tile_elems
        d_pieces.append(jnp.zeros((pad,), jnp.float32))
        g_pieces.append(jnp.zeros((pad,), jnp.float32))
        m_pieces.append(jnp.zeros((pad,), jnp.int8))
    total_tiles_padded = total_tiles + dummy_tiles
    tiles_per_core = total_tiles_padded // _NUM_CORE_SPLITS

    # One concat per stream (padding folded in -> single copy, not pad+reshape).
    d_cat = jnp.concatenate(d_pieces).reshape(-1, _LANES)
    g_cat = jnp.concatenate(g_pieces).reshape(-1, _LANES)
    m_cat = jnp.concatenate(m_pieces).reshape(-1, _LANES)

    bounds, acc = [], 0
    for nt in stage_tiles:
        acc += nt
        bounds.append(acc)

    kernel = _make_kernel(bounds, tiles_per_core)
    row_map = lambda c, i: (c * tiles_per_core + i, 0)
    acc_map = lambda c, i: (c, 0)

    # Explicit VMEM budget: 2 double-buffered f32 streams + 1 int8 stream + slack.
    vmem_limit = min(128 * 1024 * 1024,
                     max(16 * 1024 * 1024,
                         2 * 2 * tile_rows * _LANES * (4 + 4 + 1) + (2 << 20)))

    sum_out, cnt_out = pl.pallas_call(
        kernel,
        out_shape=(
            jax.ShapeDtypeStruct((_NUM_CORE_SPLITS * _STAGE_SLOTS, _LANES), jnp.float32),
            jax.ShapeDtypeStruct((_NUM_CORE_SPLITS * _STAGE_SLOTS, _LANES), jnp.float32),
        ),
        grid_spec=pltpu.PrefetchScalarGridSpec(
            num_scalar_prefetch=0,
            grid=(_NUM_CORE_SPLITS, tiles_per_core),
            in_specs=[
                pl.BlockSpec((tile_rows, _LANES), row_map),
                pl.BlockSpec((tile_rows, _LANES), row_map),
                pl.BlockSpec((tile_rows, _LANES), row_map),
            ],
            out_specs=[
                pl.BlockSpec((_STAGE_SLOTS, _LANES), acc_map),
                pl.BlockSpec((_STAGE_SLOTS, _LANES), acc_map),
            ],
        ),
        compiler_params=pltpu.CompilerParams(
            dimension_semantics=("parallel", "arbitrary"),
            vmem_limit_bytes=int(vmem_limit),
        ),
    )(d_cat, g_cat, m_cat)

    sums = sum_out.reshape(_NUM_CORE_SPLITS, _STAGE_SLOTS, _LANES).sum(axis=(0, 2))
    cnts = cnt_out.reshape(_NUM_CORE_SPLITS, _STAGE_SLOTS, _LANES).sum(axis=(0, 2))
    # mean over masked elements (NaN when a stage's mask is empty, matching torch)
    return sums[:num_stages] / cnts[:num_stages]


def aug_loss_multistage(inputs, pseudo_depth, filter_mask, dlossw=None):
    """JAX/Pallas equivalent of AugLossMultiStage.forward.

    inputs:       dict of {'stageK': {'depth': [B, H/s, W/s]}}
    pseudo_depth: [B, H, W]
    filter_mask:  [B, C, H, W]
    """
    stage_keys = sorted((k for k in inputs.keys() if 'stage' in k),
                        key=lambda k: int(k.replace('stage', '')))   # numeric sort
    if not stage_keys:
        return jnp.float32(0.0), {}

    # Threshold once at full resolution; nearest downsample == strided slice so
    # "> 0.5" commutes with it.  int8 shrinks the mask HBM stream 4x.
    mask_full = (filter_mask[:, 0, :, :] > 0.5).astype(jnp.int8)

    depth_list, gt_list, mask_list, stage_idx_list = [], [], [], []
    for k in stage_keys:
        stage_idx = int(k.replace('stage', '')) - 1
        depth_est = inputs[k]['depth']
        if stage_idx == 0:
            s = 4   # F.interpolate(scale_factor=0.25, mode='nearest')
        elif stage_idx == 1:
            s = 2   # F.interpolate(scale_factor=0.5, mode='nearest')
        else:
            s = 1
        gt_t = pseudo_depth[:, ::s, ::s]
        m_t = mask_full[:, ::s, ::s]
        assert gt_t.shape == depth_est.shape, (gt_t.shape, depth_est.shape)
        depth_list.append(depth_est)
        gt_list.append(gt_t)
        mask_list.append(m_t)
        stage_idx_list.append(stage_idx)

    losses = _fused_masked_smooth_l1(depth_list, gt_list, mask_list)

    total_loss = jnp.float32(0.0)
    scalar_outputs = {}
    for j, stage_idx in enumerate(stage_idx_list):
        w = jnp.float32(1.0) if dlossw is None else jnp.float32(dlossw[stage_idx])
        total_loss = total_loss + w * losses[j]
        scalar_outputs['aug_loss_stage{}'.format(stage_idx + 1)] = losses[j]
    return total_loss, scalar_outputs


if __name__ == "__main__":
    key = jax.random.PRNGKey(0)
    B, H, W = 2, 16, 16
    k1, k2, k3, k4, k5 = jax.random.split(key, 5)

    pseudo_depth = jax.random.uniform(k1, (B, H, W), jnp.float32, 1.0, 5.0)
    filter_mask = (jax.random.uniform(k2, (B, 1, H, W), jnp.float32) > 0.3
                   ).astype(jnp.float32)

    inputs = {
        'stage1': {'depth': jax.random.uniform(k3, (B, H // 4, W // 4),
                                               jnp.float32, 1.0, 5.0)},
        'stage2': {'depth': jax.random.uniform(k4, (B, H // 2, W // 2),
                                               jnp.float32, 1.0, 5.0)},
        'stage3': {'depth': jax.random.uniform(k5, (B, H, W),
                                               jnp.float32, 1.0, 5.0)},
    }
    dlossw = (0.5, 1.0, 2.0)

    total_loss, scalars = aug_loss_multistage(
        inputs, pseudo_depth, filter_mask, dlossw=dlossw)
    total_loss = jax.block_until_ready(total_loss)
    jax.block_until_ready(scalars)

    # Pure-JAX reference check of the fused kernel.
    ref_total = jnp.float32(0.0)
    ok = True
    for k in ('stage1', 'stage2', 'stage3'):
        si = int(k.replace('stage', '')) - 1
        s = 4 if si == 0 else (2 if si == 1 else 1)
        gt = pseudo_depth[:, ::s, ::s]
        m = filter_mask[:, 0, ::s, ::s] > 0.5
        d = inputs[k]['depth'] - gt
        ad = jnp.abs(d)
        sl1 = jnp.where(ad < 1.0, 0.5 * d * d, ad - 0.5)
        loss = jnp.sum(jnp.where(m, sl1, 0.0)) / jnp.sum(m.astype(jnp.float32))
        ref_total = ref_total + dlossw[si] * loss
        ok = ok and bool(jnp.allclose(scalars['aug_loss_stage{}'.format(si + 1)],
                                      loss, rtol=1e-4, atol=1e-5))
    ok = ok and bool(jnp.allclose(total_loss, ref_total, rtol=1e-4, atol=1e-5))

    if ok:
        print("KERNEL_OK")
    else:
        print("MISMATCH", total_loss, ref_total)
</pallas_src>

<mosaic_0001>
module attributes {stable_mosaic.version = 11 : i64} {
  func.func @kernel(%arg0: i32, %arg1: i32, %arg2: memref<32x128xf32, #tpu.memory_space<vmem>>, %arg3: memref<32x128xf32, #tpu.memory_space<vmem>>, %arg4: memref<32x128xi8, #tpu.memory_space<vmem>>, %arg5: memref<8x128xf32, #tpu.memory_space<vmem>>, %arg6: memref<8x128xf32, #tpu.memory_space<vmem>>) attributes {dimension_semantics = [#tpu.dimension_semantics<parallel>, #tpu.dimension_semantics<arbitrary>], iteration_bounds = array<i64: 2, 2>, scalar_prefetch = 0 : i64, scratch_operands = 0 : i64, tpu.core_type = #tpu.core_type<tc>, window_params = [{transform_indices = @transform_0, window_bounds = array<i64: 32, 128>}, {transform_indices = @transform_1, window_bounds = array<i64: 32, 128>}, {transform_indices = @transform_2, window_bounds = array<i64: 32, 128>}, {transform_indices = @transform_3, window_bounds = array<i64: 8, 128>}, {transform_indices = @transform_4, window_bounds = array<i64: 8, 128>}]} {
    %c0_i32 = arith.constant 0 : i32
    %0 = arith.cmpi eq, %arg1, %c0_i32 : i32
    %1 = arith.extui %0 : i1 to i32
    %c0_i32_0 = arith.constant 0 : i32
    %2 = arith.cmpi ne, %1, %c0_i32_0 : i32
    scf.if %2 {
      %cst_20 = arith.constant 0.000000e+00 : f32
      %48 = vector.broadcast %cst_20 : f32 to vector<8x128xf32>
      %c0_21 = arith.constant 0 : index
      %c0_22 = arith.constant 0 : index
      %49 = vector.load %arg5[%c0_21, %c0_22] : memref<8x128xf32, #tpu.memory_space<vmem>>, vector<8x128xf32>
      tpu.vector_store %arg5[%c0_21, %c0_22], %48 {strides = array<i32>} : memref<8x128xf32, #tpu.memory_space<vmem>>, vector<8x128xf32>,
      %cst_23 = arith.constant 0.000000e+00 : f32
      %50 = vector.broadcast %cst_23 : f32 to vector<8x128xf32>
      %c0_24 = arith.constant 0 : index
      %c0_25 = arith.constant 0 : index
      %51 = vector.load %arg6[%c0_24, %c0_25] : memref<8x128xf32, #tpu.memory_space<vmem>>, vector<8x128xf32>
      tpu.vector_store %arg6[%c0_24, %c0_25], %50 {strides = array<i32>} : memref<8x128xf32, #tpu.memory_space<vmem>>, vector<8x128xf32>,
    } else {
    }
    %c2_i32 = arith.constant 2 : i32
    %3 = arith.muli %arg0, %c2_i32 : i32
    %4 = arith.addi %3, %arg1 : i32
    %c1_i32 = arith.constant 1 : i32
    %5 = arith.cmpi sge, %4, %c1_i32 : i32
    %6 = arith.extui %5 : i1 to i32
    %c0_i32_1 = arith.constant 0 : i32
    %7 = arith.addi %c0_i32_1, %6 : i32
    %c2_i32_2 = arith.constant 2 : i32
    %8 = arith.cmpi sge, %4, %c2_i32_2 : i32
    %9 = arith.extui %8 : i1 to i32
    %10 = arith.addi %7, %9 : i32
    %c0 = arith.constant 0 : index
    %c0_3 = arith.constant 0 : index
    %11 = vector.load %arg2[%c0, %c0_3] : memref<32x128xf32, #tpu.memory_space<vmem>>, vector<32x128xf32>
    %c0_4 = arith.constant 0 : index
    %c0_5 = arith.constant 0 : index
    %12 = vector.load %arg3[%c0_4, %c0_5] : memref<32x128xf32, #tpu.memory_space<vmem>>, vector<32x128xf32>
    %13 = arith.subf %11, %12 : vector<32x128xf32>
    %14 = math.absf %13 : vector<32x128xf32>
    %cst = arith.constant 1.000000e+00 : f32
    %15 = vector.broadcast %cst : f32 to vector<32x128xf32>
    %16 = arith.cmpf olt, %14, %15 : vector<32x128xf32>
    %cst_6 = arith.constant 5.000000e-01 : f32
    %17 = vector.broadcast %cst_6 : f32 to vector<32x128xf32>
    %18 = arith.mulf %17, %13 : vector<32x128xf32>
    %19 = arith.mulf %18, %13 : vector<32x128xf32>
    %cst_7 = arith.constant 5.000000e-01 : f32
    %20 = vector.broadcast %cst_7 : f32 to vector<32x128xf32>
    %21 = arith.subf %14, %20 : vector<32x128xf32>
    %22 = arith.select %16, %19, %21 : vector<32x128xi1>, vector<32x128xf32>
    %c0_8 = arith.constant 0 : index
    %c0_9 = arith.constant 0 : index
    %23 = vector.load %arg4[%c0_8, %c0_9] : memref<32x128xi8, #tpu.memory_space<vmem>>, vector<32x128xi8>
    %c0_i8 = arith.constant 0 : i8
    %24 = vector.broadcast %c0_i8 : i8 to vector<32x128xi8>
    %25 = arith.cmpi ne, %23, %24 : vector<32x128xi8>
    %26 = arith.extui %25 : vector<32x128xi1> to vector<32x128xi32>
    %27 = arith.sitofp %26 : vector<32x128xi32> to vector<32x128xf32>
    %28 = arith.mulf %22, %27 : vector<32x128xf32>
    %cst_10 = arith.constant dense<0.000000e+00> : vector<128xf32>
    %29 = vector.multi_reduction <add>, %28, %cst_10 [0] : vector<32x128xf32> to vector<128xf32>
    %30 = vector.shape_cast %29 : vector<128xf32> to vector<1x128xf32>
    %cst_11 = arith.constant dense<0.000000e+00> : vector<128xf32>
    %31 = vector.multi_reduction <add>, %27, %cst_11 [0] : vector<32x128xf32> to vector<128xf32>
    %32 = vector.shape_cast %31 : vector<128xf32> to vector<1x128xf32>
    %33 = tpu.iota {dimensions = array<i32: 0>} : vector<8x128xi32>
    %34 = vector.broadcast %10 : i32 to vector<8x128xi32>
    %35 = arith.cmpi eq, %33, %34 : vector<8x128xi32>
    %36 = arith.extui %35 : vector<8x128xi1> to vector<8x128xi32>
    %37 = arith.sitofp %36 : vector<8x128xi32> to vector<8x128xf32>
    %c0_12 = arith.constant 0 : index
    %c0_13 = arith.constant 0 : index
    %38 = vector.load %arg5[%c0_12, %c0_13] : memref<8x128xf32, #tpu.memory_space<vmem>>, vector<8x128xf32>
    %39 = vector.broadcast %30 : vector<1x128xf32> to vector<8x128xf32>
    %40 = arith.mulf %37, %39 : vector<8x128xf32>
    %41 = arith.addf %38, %40 : vector<8x128xf32>
    %c0_14 = arith.constant 0 : index
    %c0_15 = arith.constant 0 : index
    %42 = vector.load %arg5[%c0_14, %c0_15] : memref<8x128xf32, #tpu.memory_space<vmem>>, vector<8x128xf32>
    tpu.vector_store %arg5[%c0_14, %c0_15], %41 {strides = array<i32>} : memref<8x128xf32, #tpu.memory_space<vmem>>, vector<8x128xf32>,
    %c0_16 = arith.constant 0 : index
    %c0_17 = arith.constant 0 : index
    %43 = vector.load %arg6[%c0_16, %c0_17] : memref<8x128xf32, #tpu.memory_space<vmem>>, vector<8x128xf32>
    %44 = vector.broadcast %32 : vector<1x128xf32> to vector<8x128xf32>
    %45 = arith.mulf %37, %44 : vector<8x128xf32>
    %46 = arith.addf %43, %45 : vector<8x128xf32>
    %c0_18 = arith.constant 0 : index
    %c0_19 = arith.constant 0 : index
    %47 = vector.load %arg6[%c0_18, %c0_19] : memref<8x128xf32, #tpu.memory_space<vmem>>, vector<8x128xf32>
    tpu.vector_store %arg6[%c0_18, %c0_19], %46 {strides = array<i32>} : memref<8x128xf32, #tpu.memory_space<vmem>>, vector<8x128xf32>,
    return
  }
  func.func @transform_0(%arg0: i32, %arg1: i32) -> (i32, i32) {
    %c2_i32 = arith.constant 2 : i32
    %0 = arith.muli %arg0, %c2_i32 : i32
    %1 = arith.addi %0, %arg1 : i32
    %c0_i32 = arith.constant 0 : i32
    %c0_i32_0 = arith.constant 0 : i32
    return %1, %c0_i32 : i32, i32
  }
  func.func @transform_1(%arg0: i32, %arg1: i32) -> (i32, i32) {
    %c2_i32 = arith.constant 2 : i32
    %0 = arith.muli %arg0, %c2_i32 : i32
    %1 = arith.addi %0, %arg1 : i32
    %c0_i32 = arith.constant 0 : i32
    %c0_i32_0 = arith.constant 0 : i32
    return %1, %c0_i32 : i32, i32
  }
  func.func @transform_2(%arg0: i32, %arg1: i32) -> (i32, i32) {
    %c2_i32 = arith.constant 2 : i32
    %0 = arith.muli %arg0, %c2_i32 : i32
    %1 = arith.addi %0, %arg1 : i32
    %c0_i32 = arith.constant 0 : i32
    %c0_i32_0 = arith.constant 0 : i32
    return %1, %c0_i32 : i32, i32
  }
  func.func @transform_3(%arg0: i32, %arg1: i32) -> (i32, i32) {
    %c0_i32 = arith.constant 0 : i32
    %c0_i32_0 = arith.constant 0 : i32
    return %arg0, %c0_i32 : i32, i32
  }
  func.func @transform_4(%arg0: i32, %arg1: i32) -> (i32, i32) {
    %c0_i32 = arith.constant 0 : i32
    %c0_i32_0 = arith.constant 0 : i32
    return %arg0, %c0_i32 : i32, i32
  }
}

</mosaic_0001>

<bundles_post_ra>
// kernel: tpu_custom_call.1
= control target key start
LH: loop header
LB: loop body
LE: loop exit
PB: predicated region body
PF: predicated region fallthrough
CT: control target
= control target key end

     0   :  { %s1510_s0 = inlined_call_operand.hbm [shape: f32[128,128], index: 0, kind: input, shape index: {}]   ;;  %s1511_s1 = inlined_call_operand.hbm [shape: f32[128,128], index: 1, kind: input, shape index: {}]   ;;  %s1512_s2 = inlined_call_operand.hbm [shape: s8[128,128], index: 2, kind: input, shape index: {}]   ;;  %s1513_s3 = inlined_call_operand.hbm [shape: f32[16,128], index: 3, kind: output, shape index: {0}]   ;;  %s1514_s4 = inlined_call_operand.hbm [shape: f32[16,128], index: 4, kind: output, shape index: {1}]  }
   0x1   :  { %1529 = sst [smem:[#allocation24_spill]] %s1510_s0 }
   0x2   :  { %1530 = sst [smem:[#allocation25_spill]] %s1511_s1 }
   0x3   :  { %10 = vsyncpa [#allocation3], 0 }
   0x4   :  { %12 = vsyncpa [#allocation3 + $0x1], 0 }
   0x5   :  { %13 = vsyncpa [#allocation6], 0 }
   0x6   :  { %15 = vsyncpa [#allocation6 + $0x1], 0 }
   0x7   :  { %16 = vsyncpa [#allocation4], 0 }
   0x8   :  { %18 = vsyncpa [#allocation4 + $0x1], 0 }
   0x9   :  { %19 = vsyncpa [#allocation10], 0 }
   0xa   :  { %21 = vsyncpa [#allocation10 + $0x1], 0  ;;  %s1112_s15 = smov 0   ;;  %s1114_s16 = smov 0  }
   0xb   :  { %s1116_s17 = smov 0   ;;  %s1118_s18 = smov 0  }
   0xc   :  { %s1120_s19 = smov 0   ;;  %s1122_s20 = smov 0  }
   0xd   :  { %s1124_s21 = smov 0   ;;  %s1126_s22 = smov 0  }
   0xe   :  { %s1128_s23 = smov 0   ;;  %s1130_s24 = smov 0  }
   0xf   :  { %s1132_s25 = smov 0  }
  0x10 LB: > { %1531 = sst [smem:[#allocation15_spill]] %s1043_s17  ;;  %s1166_s26 = sadd.s32 4294967295, %s1075_s25   ;;  %s1075_s25 = sphi %s1132_s25, %s27_s25   ;;  %s1071_s24 = sphi %s1130_s24, %s1575_s24   ;;  %s1067_s23 = sphi %s1128_s23, %s1574_s23   ;;  %s1063_s22 = sphi %s1126_s22, %s1573_s22   ;;  %s1059_s21 = sphi %s1124_s21, %s1572_s21   ;;  %s1055_s20 = sphi %s1122_s20, %s1571_s20   ;;  %s1051_s19 = sphi %s1120_s19, %s1579_s19   ;;  %s1047_s18 = sphi %s1118_s18, %s1578_s18   ;;  %s1043_s17 = sphi %s1116_s17, %s1569_s17   ;;  %s1039_s16 = sphi %s1114_s16, %s1577_s16   ;;  %s1035_s15 = sphi %s1112_s15, %s1576_s15  }
  0x11   : > { %1532 = sst [smem:[#allocation16_spill]] %s1055_s20  ;;  %s660_s27 = sadd.s32 4294967294, %s1075_s25  }
  0x12   : > { %1533 = sst [smem:[#allocation17_spill]] %s1067_s23  ;;  %s36_s28 = sadd.s32 1, %s1067_s23 }
  0x13   : > { %1534 = sst [smem:[#allocation18_spill]] %s1071_s24  ;;  %s39_s29 = sadd.s32 1, %s1071_s24 }
  0x14   : > { %p37_p0 = scmp.ge.s32.totalorder %s36_s28, 2  ;;  %s661_s30 = sshll.u32 %s1071_s24, 1 }
  0x15   : > { %s1173_s5 = sadd.s32 %s1067_s23, %s661_s30  ;;  %s50_s6 = sadd.s32 1, %s1055_s20 }
  0x16   : > { %s1581_s28 = smov (%p37_p0, %s36_s28), 0  ;;  %s1583_s29 = smov (!%p37_p0, %s39_s29), %s1071_s24 }
  0x17   : > { %1535 = sst [smem:[#allocation19_spill]] %s1581_s28  ;;  %p57_p1 = scmp.ne.s32.totalorder %s1055_s20, %s1051_s19 }
  0x18   : > { %p58_p2 = scmp.eq.s32.totalorder %s1075_s25, 0  ;;  %p41_p3 = scmp.ge.s32.totalorder %s1583_s29, 2 }
  0x19   : > { %p63_p4 = scmp.ne.s32.totalorder %s1051_s19, %s1047_s18  ;;  %p64_p6 = scmp.eq.s32.totalorder %s1166_s26, 0 }
  0x1a   : > { %p1183_p5 = por %p58_p2, %p57_p1  ;;  %s1585_s29 = smov (%p41_p3, %s1583_s29), 0 }
  0x1b   : > { %1537 = sst [smem:[#allocation20_spill]] %s1585_s29  ;;  %p1190_p7 = por %p64_p6, %p63_p4 }
  0x1c   : > { %s136_s9 = sadd.s32 1, %s1043_s17  ;;  %s662_s10 = sshll.u32 %s1585_s29, 1 }
  0x1d   : > { %s1538_s8 = scalar_select %p1190_p7, 1, 0 }
  0x1e   : > { %s133_s11 = ssub.s32 %s1071_s24, %s1585_s29  ;;  %s46_s12 = sadd.s32 %s662_s10, %s1581_s28 }
  0x1f   : > { %p134_p8 = scmp.eq.s32.totalorder %s133_s11, 0  ;;  %s47_s13 = ssub.s32 %s1173_s5, %s46_s12 }
  0x20   : > { %p146_p9 = scmp.ne.s32.totalorder %s1043_s17, %s1039_s16  ;;  %p48_p10 = scmp.eq.s32.totalorder %s47_s13, 0 }
  0x21   : > { %p147_p11 = scmp.eq.s32.totalorder %s1166_s26, 3  ;;  %p152_p13 = scmp.ne.s32.totalorder %s1039_s16, %s1035_s15 }
  0x22   : > { %s1204_s14 = scalar_select %p134_p8, %s1043_s17, %s136_s9  }
  0x23   : > { %s1207_s18 = scalar_select %p48_p10, %s1055_s20, %s50_s6  }
  0x24   : > { %1539 = sst [smem:[#allocation21_spill]] %s1204_s14  ;;  %p1209_p12 = por %p147_p11, %p146_p9 }
  0x25   : > { %1540 = sst [smem:[#allocation22_spill]] %s1207_s18  ;;  %p153_p0 = scmp.eq.s32.totalorder %s660_s27, 3 }
  0x26   : > { %s1541_s30 = scalar_select %p1209_p12, 1, 0 }
  0x27   : > { %p732_p1 = scmp.lt.s32.totalorder %s1075_s25, 4  ;;  %s1219_s10 = sand.u32 1, %s1055_s20  }
  0x28   : > { %p1221_p2 = por %p153_p0, %p152_p13  ;;  %s1520_s9 = sshll.u32 %s1219_s10, 5 }
  0x29   : > { %s1521_s12 = sshll.u32 %s1173_s5, 9  ;;  %p1229_p3 = pnand %p732_p1, %p1183_p5 }
  0x2a   : > { %s1542_s11 = scalar_select %p1221_p2, 1, 0 }
  0x2b   : > { %s1544_s6 = scalar_select %p1229_p3, 1, 0 }
  0x2c   : > { %1543 = sst [smem:[#allocation23_spill]] %s1542_s11  ;;  %s222_s13 = sand.u32 1, %s1075_s25  }
  0x2d   : > { %s1545_s1 = sld [smem:[#allocation25_spill]]  ;;  %s226_s24 = scalar_lea.vmem [#allocation5], %s1520_s9 }
  0x2e   : > { %s235_s23 = sshll.u32 %s226_s24, 4  ;;  %s1246_s7 = scalar_lea.sflag [#allocation6], %s222_s13  ;;  %s1243_s23 = int_to_ptr.vmem [resolvable:$true] %s235_s23 }
  0x2f   : > { %p1252_p6 = pneg %p1229_p3 }
  0x33   : > { %s1239_s28 = scalar_lea.hbm %s1545_s1, %s1521_s12  ;;  %s832_s24 = scalar_lea.hbm %s1545_s1, 2048 }
  0x34   : > { %s827_s18 = scalar_lea.hbm %s1239_s28, 512  ;;  %p833_p10 = scmp.lt.u32.totalorder %s1239_s28, %s1545_s1 }
  0x35   : > { %p828_p5 = scmp.ne.s32.totalorder %s1239_s28, %s827_s18  ;;  %p834_p11 = scmp.lt.u32.totalorder %s832_s24, %s827_s18 }
  0x36   : > { %p836_p0 = scmp.lt.u32.totalorder %s827_s18, %s1239_s28 }
  0x37   : > { %p830_p8 = pnand %p1252_p6, %p828_p5  ;;  %p835_p13 = por %p834_p11, %p833_p10 }
  0x39   : > { %p831_p9 = pneg %p830_p8  ;;  %p837_p1 = por %p836_p0, %p835_p13 }
  0x3b   : > { %p838_p4 = pnand %p837_p1, %p831_p9 }
  0x3d   : > { %841 = shalt.err (!%p838_p4)
}
  0x3e   : > { %s842_s13 = scalar_lea.vmem %s1243_s23, 512  ;;  %s1077_s29 = smov [#allocation5]  }
  0x3f   : > { %p843_p5 = scmp.ne.s32.totalorder %s1243_s23, %s842_s13  ;;  %s847_s27 = sshll.u32 %s1077_s29, 4  ;;  %s848_s27 = int_to_ptr.vmem [resolvable:$false] %s847_s27 }
  0x40   : > { %s849_s9 = scalar_lea.vmem %s848_s27, 1024  ;;  %p850_p12 = scmp.lt.s32.totalorder %s1243_s23, %s848_s27 }
  0x41   : > { %p845_p8 = pnand %p843_p5, %p1252_p6  ;;  %p851_p7 = scmp.lt.s32.totalorder %s849_s9, %s842_s13 }
  0x43   : > { %p846_p2 = pneg %p845_p8  ;;  %p852_p10 = por %p851_p7, %p850_p12 }
  0x45   : > { %p853_p11 = pnand %p852_p10, %p846_p2 }
  0x47   : > { %856 = shalt.err (!%p853_p11)
}
  0x48   : > { %s1525_s18 = smov 128   ;;  %s1526_s12 = smov 8  }
  0x49   : > { %721 = dma.hbm_to_vmem [thread:$0]  (!%p1229_p3), %s1239_s28, 512, %s1243_s23, %s1246_s7, %s1525_s18, %s1525_s18, %s1526_s12  }
  0x4a   : > { %p263_p7 = scmp.lt.s32.totalorder %s1075_s25, 5  ;;  %p1547_p12 = scmp.ge.s32.totalorder %s1075_s25, 1 }
  0x4b   : > { %s1549_s13 = sshll.u32 %s1173_s5, 9  ;;  %s1550_s0 = sld [smem:[#allocation24_spill]] }
  0x4c   : > { %p1282_p2 = pnand %p1547_p12, %p263_p7  ;;  %s1551_s1 = sshll.u32 %s1219_s10, 5 }
  0x4d   : > { %s203_s14 = scalar_lea.vmem [#allocation2], %s1551_s1  ;;  %s677_s23 = sshll.u32 %s1219_s10, 3 }
  0x4e   : > { %s1548_s24 = scalar_select %p1282_p2, 1, 0 }
  0x4f   : > { %s212_s17 = sshll.u32 %s203_s14, 4  ;;  %s200_s28 = scalar_lea.sflag [#allocation3], %s1219_s10  ;;  %s1295_s17 = int_to_ptr.vmem [resolvable:$true] %s212_s17 }
  0x51   : > { %s1291_s9 = scalar_lea.hbm %s1550_s0, %s1549_s13  ;;  %s862_s13 = scalar_lea.hbm %s1550_s0, 2048 }
  0x52   : > { %s857_s18 = scalar_lea.hbm %s1291_s9, 512  ;;  %p863_p0 = scmp.lt.u32.totalorder %s1291_s9, %s1550_s0 }
  0x53   : > { %p858_p4 = scmp.ne.s32.totalorder %s1291_s9, %s857_s18  ;;  %p864_p1 = scmp.lt.u32.totalorder %s862_s13, %s857_s18 }
  0x54   : > { %p866_p8 = scmp.lt.u32.totalorder %s857_s18, %s1291_s9 }
  0x55   : > { %p860_p9 = pnand %p858_p4, %p1252_p6  ;;  %p865_p5 = por %p864_p1, %p863_p0 }
  0x57   : > { %p861_p13 = pneg %p860_p9  ;;  %p867_p10 = por %p866_p8, %p865_p5 }
  0x59   : > { %p868_p11 = pnand %p867_p10, %p861_p13 }
  0x5b   : > { %871 = shalt.err (!%p868_p11)
}
  0x5c   : > { %s872_s1 = scalar_lea.vmem %s1295_s17, 512  ;;  %s1080_s14 = smov [#allocation2]  }
  0x5d   : > { %p873_p7 = scmp.ne.s32.totalorder %s1295_s17, %s872_s1  ;;  %s877_s12 = sshll.u32 %s1080_s14, 4  ;;  %s878_s12 = int_to_ptr.vmem [resolvable:$false] %s877_s12 }
  0x5e   : > { %s879_s11 = scalar_lea.vmem %s878_s12, 1024  ;;  %p880_p9 = scmp.lt.s32.totalorder %s1295_s17, %s878_s12 }
  0x5f   : > { %p875_p12 = pnand %p873_p7, %p1252_p6  ;;  %p881_p2 = scmp.lt.s32.totalorder %s879_s11, %s872_s1 }
  0x61   : > { %p876_p4 = pneg %p875_p12  ;;  %p882_p0 = por %p881_p2, %p880_p9 }
  0x63   : > { %p883_p1 = pnand %p882_p0, %p876_p4 }
  0x65   : > { %886 = shalt.err (!%p883_p1)
}
  0x66   : > { %s1552_s18 = smov 8   ;;  %s1553_s29 = smov 128  }
  0x67   : > { %718 = dma.hbm_to_vmem [thread:$0]  (!%p1229_p3), %s1291_s9, 512, %s1295_s17, %s200_s28, %s1553_s29, %s1553_s29, %s1552_s18  }
  0x68   : > { %s679_s13 = sshll.u32 %s1173_s5, 7  ;;  %s249_s12 = scalar_lea.vmem [#allocation7], %s677_s23 }
  0x69   : > { %s1329_s1 = scalar_lea.hbm %s1512_s2, %s679_s13  ;;  %s258_s11 = sshll.u32 %s249_s12, 4  ;;  %s259_s11 = int_to_ptr.vmem [resolvable:$true] %s258_s11 }
  0x6a   : > { %s887_s0 = scalar_lea.hbm %s1329_s1, 128  ;;  %s892_s9 = scalar_lea.hbm %s1512_s2, 512 }
  0x6b   : > { %p888_p2 = scmp.ne.s32.totalorder %s1329_s1, %s887_s0  ;;  %p893_p8 = scmp.lt.u32.totalorder %s1329_s1, %s1512_s2 }
  0x6c   : > { %p894_p10 = scmp.lt.u32.totalorder %s892_s9, %s887_s0  ;;  %p896_p7 = scmp.lt.u32.totalorder %s887_s0, %s1329_s1 }
  0x6d   : > { %p890_p13 = pnand %p888_p2, %p1252_p6 }
  0x6e   : > { %p895_p11 = por %p894_p10, %p893_p8 }
  0x6f   : > { %p891_p5 = pneg %p890_p13 }
  0x70   : > { %p897_p12 = por %p896_p7, %p895_p11 }
  0x72   : > { %p898_p4 = pnand %p897_p12, %p891_p5 }
  0x74   : > { %901 = shalt.err (!%p898_p4)
}
  0x75   : > { %s902_s10 = scalar_lea.vmem %s259_s11, 128  ;;  %s1081_s23 = smov [#allocation7]  }
  0x76   : > { %p903_p9 = scmp.ne.s32.totalorder %s259_s11, %s902_s10  ;;  %s907_s29 = sshll.u32 %s1081_s23, 4  ;;  %s908_s29 = int_to_ptr.vmem [resolvable:$false] %s907_s29 }
  0x77   : > { %s909_s13 = scalar_lea.vmem %s908_s29, 256  ;;  %p910_p2 = scmp.lt.s32.totalorder %s259_s11, %s908_s29 }
  0x78   : > { %p905_p0 = pnand %p903_p9, %p1252_p6  ;;  %p911_p13 = scmp.lt.s32.totalorder %s909_s13, %s902_s10 }
  0x7a   : > { %p906_p1 = pneg %p905_p0  ;;  %p912_p3 = por %p911_p13, %p910_p2 }
  0x7c   : > { %p913_p8 = pnand %p912_p3, %p906_p1 }
  0x7e   : > { %916 = shalt.err (!%p913_p8)
}
  0x7f   : > { %p1554_p10 = scmp.ne.s32.totalorder %s1544_s6, 0  ;;  %p1555_p5 = scmp.ne.s32.totalorder %s1548_s24, 0 }
  0x80   : > { %s269_s0 = sand.u32 (!%p1555_p5), 1, %s1051_s19   ;;  %p1556_p6 = scmp.ne.s32.totalorder (!%p1555_p5), %s1538_s8, 0 }
  0x81   : > { %724 = dma.hbm_to_vmem [thread:$0]  (!%p1554_p10), %s1329_s1, 128, %s259_s11, %s1246_s7  }
  0x82   : > { %267 = sbr.rel (%p1555_p5) target bundleno = 232 (0xe8), region = 32  ;;  %s681_s20 = sshll.u32 (!%p1555_p5), %s269_s0, 5 }
  0x83   : > { %s270_s27 = scalar_lea.sflag (!%p1555_p5), [#allocation3], %s269_s0  ;;  %s273_s14 = scalar_lea.vmem (!%p1555_p5), [#allocation2], %s681_s20 }
  0x89   : > { %1018 = dma.done.wait (%p1556_p6), %s270_s27, 512  }
  0x8a   : > { %1020 = vsyncadd (%p1556_p6), %s270_s27, 4294966784  ;;  %s278_s6 = sand.u32 1, %s1166_s26   ;;  %s282_s17 = scalar_lea.vmem [#allocation5], %s681_s20 }
  0x8b   : > { %s279_s12 = scalar_lea.sflag [#allocation6], %s278_s6 }
  0x8c   : > { %1022 = dma.done.wait (%p1556_p6), %s279_s12, 640  }
  0x8d   : > { %1024 = vsyncadd (%p1556_p6), %s279_s12, 4294966656  ;;  %s683_s7 = sshll.u32 %s269_s0, 3  ;;  %s1364_s24 = sand.u32 1, %s1039_s16  }
  0x8e   : > { %s684_s1 = sshll.u32 %s1364_s24, 3  ;;  %s291_s11 = scalar_lea.vmem [#allocation7], %s683_s7 }
  0x8f   : > { %s1367_s5 = scalar_lea.vmem [#allocation8], %s684_s1  ;;  %s1369_s9 = scalar_lea.vmem [#allocation9], %s684_s1 }
  0x90   : > { %p686_p3 = scmp.ne.s32.totalorder %s1059_s21, 0 }
  0x91   : > { %v1082_v0 = vmov (!%p686_p3), 0.0  }
  0x92   : > { %344 = sbr.rel (%p686_p3) target bundleno = 153 (0x99), region = 48  ;;  %345 = vst [vmem:[%s1367_s5] sm:$0xff] (!%p686_p3), %v1082_v0  ;;  %346 = vst [vmem:[%s1369_s9] sm:$0xff] (!%p686_p3), %v1082_v0 }
  0x99 PF: > { %v354_v1 = vld [vmem:[%s273_s14] sm:$0xff]  ;;  %v355_v2 = vld [vmem:[%s273_s14 + $0x8] sm:$0xff]  ;;  %v356_v3 = vld [vmem:[%s273_s14 + $0x10] sm:$0xff]  ;;  %v1083_v20 = vmov 0   ;;  %s687_s26 = sshll.u32 %s1063_s22, 1  ;;  %v1084_v60 = vmov 0.0  }
  0x9a   : > { %v358_v4 = vld [vmem:[%s282_s17] sm:$0xff]  ;;  %v359_v5 = vld [vmem:[%s282_s17 + $0x8] sm:$0xff]  ;;  %v357_v6 = vld [vmem:[%s273_s14 + $0x18] sm:$0xff]  ;;  %s1392_s8 = sadd.s32 %s1059_s21, %s687_s26  ;;  %s699_s10 = sshll.u32 %s1063_s22, 7 }
  0x9b   : > { %v360_v7 = vld [vmem:[%s282_s17 + $0x10] sm:$0xff]  ;;  %v361_v8 = vld [vmem:[%s282_s17 + $0x18] sm:$0xff]  ;;  %v362_v9 = vsub.f32 %v354_v1, %v358_v4  ;;  %v363_v10 = vsub.f32 %v355_v2, %v359_v5  ;;  %v390_v11 = vld [vmem:[%s291_s11] sm:$0xff]  ;;  %p349_p11 = scmp.ge.s32.totalorder %s1392_s8, 1  ;;  %p351_p7 = scmp.ge.s32.totalorder %s1392_s8, 2 }
  0x9c   : > { %v364_v12 = vsub.f32 %v356_v3, %v360_v7  ;;  %v365_v13 = vsub.f32 %v357_v6, %v361_v8  ;;  %vm391_vm0 = vnez %v390_v11  ;;  %s497_s23 = sshll.u32 %s1369_s9, 4  ;;  %s484_s29 = sshll.u32 %s1367_s5, 4  ;;  %s1418_s23 = int_to_ptr.vmem [resolvable:$true] %s497_s23  ;;  %s1425_s29 = int_to_ptr.vmem [resolvable:$true] %s484_s29 }
  0x9d   : > { %v366_v14 = vand.u32 2147483647, %v362_v9  ;;  %v367_v15 = vand.u32 2147483647, %v363_v10  ;;  %v374_v18 = vmul.f32 0.5, %v362_v9  ;;  %v375_v19 = vmul.f32 0.5, %v363_v10  ;;  %s1416_s20 = scalar_lea.hbm %s1514_s4, %s699_s10  ;;  %s1423_s14 = scalar_lea.hbm %s1513_s3, %s699_s10 }
  0x9e   : > { %v368_v16 = vand.u32 2147483647, %v364_v12  ;;  %v369_v17 = vand.u32 2147483647, %v365_v13  ;;  %v392_v21 = vsel %vm391_vm0, 16843009, %v1083_v20 }
  0x9f   : > { %vm1374_vm1 = vcmp.lt.f32.partialorder %v366_v14, 1.0  ;;  %vm1378_vm2 = vcmp.lt.f32.partialorder %v367_v15, 1.0  ;;  %v393_v24 = vunpack.c.0.s8 %v392_v21  ;;  %v394_v25 = vunpack.c.1.s8 %v392_v21  ;;  %s350_s21 = scalar_select %p349_p11, 1, 0 }
  0xa0   : > { %v376_v26 = vmul.f32 0.5, %v364_v12  ;;  %v377_v27 = vmul.f32 0.5, %v365_v13  ;;  %v395_v28 = vunpack.c.2.s8 %v392_v21  ;;  %v396_v29 = vunpack.c.3.s8 %v392_v21  ;;  %s352_s28 = scalar_select %p351_p7, 1, 0 }
  0xa1   : > { %vm1382_vm3 = vcmp.lt.f32.partialorder %v368_v16, 1.0  ;;  %vm1386_vm4 = vcmp.lt.f32.partialorder %v369_v17, 1.0  ;;  %v397_v32 = vpack.c.b16 %v393_v24, %v393_v24  ;;  %v399_v33 = vpack.c.b16 %v394_v25, %v394_v25  ;;  %s471_s6 = scalar_lea.sflag [#allocation10], %s1364_s24  ;;  %s917_s12 = scalar_lea.vmem %s1418_s23, 128 }
  0xa2   : > { %v378_v34 = vmul.f32 %v374_v18, %v362_v9  ;;  %v379_v35 = vmul.f32 %v375_v19, %v363_v10  ;;  %v401_v36 = vpack.c.b16 %v395_v28, %v395_v28  ;;  %v403_v37 = vpack.c.b16 %v396_v29, %v396_v29  ;;  %s353_s18 = sadd.s32 %s352_s28, %s350_s21  ;;  %v457_v28 = vld [vmem:[%s1367_s5] sm:$0xff]  ;;  %p918_p12 = scmp.ne.s32.totalorder %s1418_s23, %s917_s12 }
  0xa3   : > { %v688_v38 = vadd.f32 -0.5, %v366_v14  ;;  %v689_v39 = vadd.f32 -0.5, %v367_v15  ;;  %v398_v40 = vpack.c.b8 %v397_v32, %v397_v32  ;;  %v400_v41 = vpack.c.b8 %v399_v33, %v399_v33  ;;  %p1565_p4 = scmp.ne.s32.totalorder %s1541_s30, 0  ;;  %s1085_s17 = smov [#allocation9]  }
  0xa4   : > { %v380_v42 = vmul.f32 %v376_v26, %v364_v12  ;;  %v381_v43 = vmul.f32 %v377_v27, %v365_v13  ;;  %v402_v44 = vpack.c.b8 %v401_v36, %v401_v36  ;;  %v404_v45 = vpack.c.b8 %v403_v37, %v403_v37  ;;  %v461_v27 = vld [vmem:[%s1369_s9] sm:$0xff]  ;;  %s921_s7 = sshll.u32 %s1085_s17, 4  ;;  %s922_s7 = int_to_ptr.vmem [resolvable:$false] %s921_s7 }
  0xa5   : > { %v690_v46 = vadd.f32 -0.5, %v368_v16  ;;  %v691_v47 = vadd.f32 -0.5, %v369_v17  ;;  %vm405_vm5 = vnez %v398_v40  ;;  %vm406_vm6 = vnez %v400_v41  ;;  %p919_p9 = pnand %p918_p12, %p1565_p4  ;;  %s923_s1 = scalar_lea.vmem %s922_s7, 256 }
  0xa6   : > { %vm407_vm7 = vnez %v402_v44  ;;  %vm408_vm8 = vnez %v404_v45  ;;  %v409_v48 = vsel %vm405_vm5, 16843009, %v1083_v20  ;;  %v410_v49 = vsel %vm406_vm6, 16843009, %v1083_v20  ;;  %p924_p1 = scmp.lt.s32.totalorder %s1418_s23, %s922_s7  ;;  %p925_p2 = scmp.lt.s32.totalorder %s923_s1, %s917_s12 }
  0xa7   : > { %v411_v50 = vsel %vm407_vm7, 16843009, %v1083_v20  ;;  %v412_v51 = vsel %vm408_vm8, 16843009, %v1083_v20  ;;  %v413_v52 = vunpack.c.0.s8 %v409_v48  ;;  %v414_v53 = vunpack.c.0.s8 %v410_v49  ;;  %p920_p0 = pneg %p919_p9 }
  0xa8   : > { %v386_v54 = vsel %vm1374_vm1, %v378_v34, %v688_v38  ;;  %v387_v55 = vsel %vm1378_vm2, %v379_v35, %v689_v39  ;;  %v415_v56 = vunpack.c.0.s8 %v411_v50  ;;  %v416_v57 = vunpack.c.0.s8 %v412_v51  ;;  %p926_p13 = por %p925_p2, %p924_p1 }
  0xa9   : > { %v388_v58 = vsel %vm1382_vm3, %v380_v42, %v690_v46  ;;  %v389_v59 = vsel %vm1386_vm4, %v381_v43, %v691_v47  ;;  %vm417_vm9 = vcmp.ne.s32.totalorder %v413_v52, 0  ;;  %vm418_vm10 = vcmp.ne.s32.totalorder %v414_v53, 0 }
  0xaa   : > { %vm419_vm11 = vcmp.ne.s32.totalorder %v415_v56, 0  ;;  %vm420_vm12 = vcmp.ne.s32.totalorder %v416_v57, 0  ;;  %v692_v61 = vsel %vm417_vm9, 1.0, %v1084_v60  ;;  %v693_v62 = vsel %vm418_vm10, 1.0, %v1084_v60  ;;  %p927_p8 = pnand %p926_p13, %p920_p0 }
  0xab   : > { %v694_v63 = vsel %vm419_vm11, 1.0, %v1084_v60  ;;  %v695_v0 = vsel %vm420_vm12, 1.0, %v1084_v60  ;;  %v429_v1 = vmul.f32 %v692_v61, %v386_v54  ;;  %v430_v2 = vmul.f32 %v693_v62, %v387_v55 }
  0xac   : > { %v431_v3 = vmul.f32 %v694_v63, %v388_v58  ;;  %v442_v4 = vadd.f32 %v693_v62, %v692_v61  ;;  %v432_v5 = vmul.f32 %v695_v0, %v389_v59  ;;  %v451_v9 = vlaneseq }
  0xad   : > { %v433_v6 = vadd.f32 %v430_v2, %v429_v1  ;;  %v453_v17 = vstv %s353_s18 }
  0xae   : > { %v443_v7 = vadd.f32 %v694_v63, %v442_v4  ;;  %v452_v14 = vshrl.u32 %v451_v9, 7 }
  0xaf   : > { %v434_v8 = vadd.f32 %v433_v6, %v431_v3 }
  0xb0   : > { %v444_v10 = vadd.f32 %v695_v0, %v443_v7  ;;  %vm454_vm13 = vcmp.eq.s32.totalorder %v452_v14, %v453_v17 }
  0xb1   : > { %v435_v11 = vadd.f32 %v434_v8, %v432_v5  ;;  %v696_v24 = vsel %vm454_vm13, 1.0, %v1084_v60 }
  0xb2   : > { %v445_v12 = vrot.slane %v444_v10, 4 }
  0xb3   : > { %v436_v13 = vrot.slane %v435_v11, 4 }
  0xb4   : > { %v446_v15 = vadd.f32 %v445_v12, %v444_v10 }
  0xb5   : > { %v437_v16 = vadd.f32 %v436_v13, %v435_v11 }
  0xb6   : > { %v447_v18 = vrot.slane %v446_v15, 2 }
  0xb7   : > { %v438_v19 = vrot.slane %v437_v16, 2 }
  0xb8   : > { %v448_v20 = vadd.f32 %v447_v18, %v446_v15 }
  0xb9   : > { %v439_v21 = vadd.f32 %v438_v19, %v437_v16 }
  0xba   : > { %v449_v22 = vrot.slane %v448_v20, 1 }
  0xbb   : > { %v440_v23 = vrot.slane %v439_v21, 1 }
  0xbc   : > { %v450_v25 = vadd.f32 %v449_v22, %v448_v20 }
  0xbd   : > { %v441_v26 = vadd.f32 %v440_v23, %v439_v21 }
  0xbe   : > { %v462_v29 = vmul.f32 %v696_v24, %v450_v25 }
  0xbf   : > { %v458_v30 = vmul.f32 %v696_v24, %v441_v26 }
  0xc0   : > { %v463_v31 = vadd.f32 %v462_v29, %v461_v27 }
  0xc1   : > { %v459_v32 = vadd.f32 %v458_v30, %v457_v28 }
  0xc2   : > { %464 = vst [vmem:[%s1369_s9] sm:$0xff] %v463_v31 }
  0xc3   : > { %460 = vst [vmem:[%s1367_s5] sm:$0xff] %v459_v32 }
  0xc4   : > { %930 = shalt.err (!%p927_p8)
}
  0xc5   : > { %s931_s11 = scalar_lea.hbm %s1416_s20, 128  ;;  %s935_s26 = scalar_lea.hbm %s1514_s4, 256 }
  0xc6   : > { %p932_p10 = scmp.ne.s32.totalorder %s1416_s20, %s931_s11  ;;  %p936_p3 = scmp.lt.u32.totalorder %s1416_s20, %s1514_s4 }
  0xc7   : > { %p937_p11 = scmp.lt.u32.totalorder %s935_s26, %s931_s11  ;;  %p939_p12 = scmp.lt.u32.totalorder %s931_s11, %s1416_s20 }
  0xc8   : > { %p933_p5 = pnand %p932_p10, %p1565_p4 }
  0xc9   : > { %p938_p7 = por %p937_p11, %p936_p3 }
  0xca   : > { %p934_p6 = pneg %p933_p5 }
  0xcb   : > { %p940_p9 = por %p939_p12, %p938_p7 }
  0xcd   : > { %p941_p0 = pnand %p940_p9, %p934_p6 }
  0xcf   : > { %944 = shalt.err (!%p941_p0)
}
  0xd0   : > { %712 = dma.vmem_to_hbm [thread:$0]  (%p1565_p4), %s1418_s23, 128, %s1416_s20, %s471_s6  }
  0xd1   : > { %s466_s28 = scalar_lea.sflag [#allocation4], %s1364_s24  ;;  %s945_s18 = scalar_lea.vmem %s1425_s29, 128 }
  0xd2   : > { %p946_p1 = scmp.ne.s32.totalorder %s1425_s29, %s945_s18  ;;  %s1086_s10 = smov [#allocation8]  }
  0xd3   : > { %s949_s13 = sshll.u32 %s1086_s10, 4  ;;  %s950_s13 = int_to_ptr.vmem [resolvable:$false] %s949_s13 }
  0xd4   : > { %p947_p2 = pnand %p946_p1, %p1565_p4  ;;  %s951_s0 = scalar_lea.vmem %s950_s13, 256 }
  0xd5   : > { %p952_p8 = scmp.lt.s32.totalorder %s1425_s29, %s950_s13  ;;  %p953_p10 = scmp.lt.s32.totalorder %s951_s0, %s945_s18 }
  0xd6   : > { %p948_p13 = pneg %p947_p2 }
  0xd7   : > { %p954_p5 = por %p953_p10, %p952_p8 }
  0xd9   : > { %p955_p6 = pnand %p954_p5, %p948_p13 }
  0xdb   : > { %958 = shalt.err (!%p955_p6)
}
  0xdc   : > { %s959_s24 = scalar_lea.hbm %s1423_s14, 128  ;;  %s963_s27 = scalar_lea.hbm %s1513_s3, 256 }
  0xdd   : > { %p960_p3 = scmp.ne.s32.totalorder %s1423_s14, %s959_s24  ;;  %p964_p12 = scmp.lt.u32.totalorder %s1423_s14, %s1513_s3 }
  0xde   : > { %p965_p9 = scmp.lt.u32.totalorder %s963_s27, %s959_s24  ;;  %p967_p1 = scmp.lt.u32.totalorder %s959_s24, %s1423_s14 }
  0xdf   : > { %p961_p11 = pnand %p960_p3, %p1565_p4 }
  0xe0   : > { %p966_p0 = por %p965_p9, %p964_p12 }
  0xe1   : > { %p962_p7 = pneg %p961_p11 }
  0xe2   : > { %p968_p2 = por %p967_p1, %p966_p0 }
  0xe4   : > { %p969_p13 = pnand %p968_p2, %p962_p7 }
  0xe6   : > { %972 = shalt.err (!%p969_p13)
}
  0xe7   : > { %711 = dma.vmem_to_hbm [thread:$0]  (%p1565_p4), %s1425_s29, 128, %s1423_s14, %s466_s28  }
  0xe8 PF: > { %s1566_s12 = sld [smem:[#allocation23_spill]]  ;;  %p733_p8 = scmp.ge.s32.totalorder %s1075_s25, 2 }
  0xe9   : > { %s509_s17 = sand.u32 1, %s1035_s15  }
  0xea   : > { %s510_s7 = scalar_lea.sflag [#allocation4], %s509_s17 }
  0xee   : > { %p1567_p10 = scmp.ne.s32.totalorder %s1566_s12, 0 }
  0xf0   : > { %p726_p5 = pnand %p733_p8, %p1567_p10 }
  0xf2   : > { %1026 = dma.done.wait (!%p726_p5), %s510_s7, 128  }
  0xf3   : > { %1028 = vsyncadd (!%p726_p5), %s510_s7, 4294967168  ;;  %s519_s1 = scalar_lea.sflag [#allocation10], %s509_s17 }
  0xf4   : > { %1030 = dma.done.wait (!%p726_p5), %s519_s1, 128  }
  0xf5   : > { %1032 = vsyncadd (!%p726_p5), %s519_s1, 4294967168  ;;  %s27_s25 = sadd.s32 1, %s1075_s25   ;;  %s1568_s30 = sld [smem:[#allocation15_spill]] }
  0xf6   : > { %p24_p6 = scmp.ge.s32.totalorder %s27_s25, 6   ;;  %s1569_s17 = sld [smem:[#allocation21_spill]] }
  0xf7   : > { %s1570_s29 = sld [smem:[#allocation16_spill]]  ;;  %s1571_s20 = sld [smem:[#allocation22_spill]] }
  0xf8   : > { %s1572_s21 = sld [smem:[#allocation17_spill]]  ;;  %s1573_s22 = sld [smem:[#allocation18_spill]] }
  0xf9   : > { %s1574_s23 = sld [smem:[#allocation19_spill]]  ;;  %s1575_s24 = sld [smem:[#allocation20_spill]] }
  0xfa   : > { %s1576_s15 = smov %s1039_s16  ;;  %s1578_s18 = smov %s1051_s19 }
  0xfb   : > { %s1577_s16 = smov %s1568_s30  ;;  %26 = sbr.rel (!%p24_p6) target bundleno = 16 (0x10), region = 122 }
  0xfd   : > { %s1579_s19 = smov %s1570_s29 }
 0x102   :  { %524 = vsyncpa [#allocation3], 1 }
 0x103   :  { %526 = vsyncpa [#allocation3 + $0x1], 1 }
 0x104   :  { %527 = vsyncpa [#allocation6], 1 }
 0x105   :  { %529 = vsyncpa [#allocation6 + $0x1], 1 }
 0x106   :  { %530 = vsyncpa [#allocation4], 1 }
 0x107   :  { %532 = vsyncpa [#allocation4 + $0x1], 1 }
 0x108   :  { %533 = vsyncpa [#allocation10], 1 }
 0x109   :  { %535 = vsyncpa [#allocation10 + $0x1], 1 }

</bundles_post_ra>
